<compile_context>
chip_gen: v7x
topology: tpu7x:2x2x1
jax: 0.10.0
libtpu: 0.0.40
codegen_flags: <defaults>
</compile_context>

<pallas_src>
import math

import jax
import jax.numpy as jnp
from jax import lax
from jax.experimental import pallas as pl
from jax.experimental.pallas import tpu as pltpu

IN_DIM = 1
HIDDEN = 64
MID = 30
MAX_ACTION_NUM = 16   # stand-in for data_set.count (SC_DataGenerator is external)


def _round_up(x, m):
    return (x + m - 1) // m * m


def _make_kernel(tile_b, rows_in_last_tile, val_col):
    """tile_b / rows_in_last_tile / val_col are static Python ints."""
    f32 = jnp.float32
    bf16 = jnp.bfloat16

    def kernel(x_ref, w1_ref, b1_ref, wh_ref, bh_ref, wo_ref, bo_ref,
               q_ref, part_ref):
        # ---- trunk: fc1 is a K=1 contraction -> VPU outer product (f32) ----
        x = x_ref[...]                                            # (tile_b, 1)
        h = jnp.maximum(x * w1_ref[...] + b1_ref[...], 0.0)      # (tile_b, HIDDEN)

        # ---- fused value|advantage hidden layers: one bf16 MXU matmul ------
        va = jnp.dot(h.astype(bf16), wh_ref[...],
                     preferred_element_type=f32) + bh_ref[...]    # (tile_b, 128)
        va = jnp.maximum(va, 0.0)

        # ---- fused block-diagonal (noisy) output layer: one bf16 MXU matmul
        # columns [0, A): advantages, column A: value, columns > A: zero pad.
        out2 = jnp.dot(va.astype(bf16), wo_ref[...],
                       preferred_element_type=f32) + bo_ref[...]  # (tile_b, out_pad)

        values = out2[:, val_col:val_col + 1]                     # (tile_b, 1)
        q_ref[...] = out2 + values        # cols [0, A): V + adv (mean added later)

        # ---- per-tile advantage column partial sums (mean finished in wrapper)
        def col_sum(y):                               # sublane reduce only
            return jnp.broadcast_to(jnp.sum(y, axis=0, keepdims=True),
                                    part_ref.shape)

        if rows_in_last_tile == tile_b:               # static: no padded rows
            part_ref[...] = col_sum(out2)
        else:
            t = pl.program_id(0)
            last = pl.num_programs(0) - 1

            @pl.when(t != last)
            def _():
                part_ref[...] = col_sum(out2)

            @pl.when(t == last)                       # mask only the padded tile
            def _():
                rid = lax.broadcasted_iota(jnp.int32, out2.shape, 0)
                part_ref[...] = col_sum(
                    jnp.where(rid < rows_in_last_tile, out2, 0.0))

    return kernel


def _pack_weights(params, eps_in, eps_out):
    """Per-call weight packing (tiny).  The NoisyLinear factorized noise is
    folded into the effective advantage weights HERE, not per grid step."""
    (w1, b1, wv1, bv1, wv2, bv2, wa1, ba1, wa2, ba2, sigma_w, sigma_b) = params
    f32, bf16 = jnp.float32, jnp.bfloat16

    hidden = w1.shape[1]
    mid = wv1.shape[1]
    A = wa2.shape[1]
    out_pad = _round_up(A + 1, 128)       # lane-dense output slab; value col = A
    mid2 = _round_up(2 * mid, 128)        # lane-dense fused mid dimension
    val_col = A

    # NoisyLinear1 factorized noise folded into the advantage output weights.
    f = lambda e: jnp.sign(e) * jnp.sqrt(jnp.abs(e))
    f_in = f(eps_in.astype(f32))[:, None]               # (mid, 1)
    f_out = f(eps_out.astype(f32))[None, :]              # (1, A)
    wa2_eff = wa2 + sigma_w * (f_in * f_out)
    ba2_eff = ba2 + sigma_b * f_out

    w_h = jnp.zeros((hidden, mid2), f32)
    w_h = w_h.at[:, :mid].set(wv1).at[:, mid:2 * mid].set(wa1)
    b_h = jnp.zeros((1, mid2), f32)
    b_h = b_h.at[0, :mid].set(bv1[0]).at[0, mid:2 * mid].set(ba1[0])

    w_o = jnp.zeros((mid2, out_pad), f32)
    w_o = w_o.at[:mid, val_col].set(wv2[:, 0])            # value column
    w_o = w_o.at[mid:2 * mid, :A].set(wa2_eff)            # noisy advantage block
    b_o = jnp.zeros((1, out_pad), f32)
    b_o = b_o.at[0, :A].set(ba2_eff[0]).at[0, val_col].set(bv2[0, 0])

    packed = (w1.astype(f32), b1.astype(f32),
              w_h.astype(bf16), b_h, w_o.astype(bf16), b_o)
    return packed, A, val_col, out_pad


def dueling_forward(x, params, eps_in, eps_out, *, block_rows=1024):
    """Fused Pallas forward.  x: (B, 1) f32 -> (B, A) f32 Q-values."""
    f32 = jnp.float32
    packed, A, val_col, out_pad = _pack_weights(params, eps_in, eps_out)
    w1, b1, w_h, b_h, w_o, b_o = packed
    hidden = w1.shape[1]
    mid2 = w_h.shape[1]

    B = x.shape[0]
    tile_b = min(_round_up(B, 8), _round_up(block_rows, 8))
    b_pad = _round_up(B, tile_b)
    num_tiles = b_pad // tile_b
    rows_in_last = B - (num_tiles - 1) * tile_b

    x_p = jnp.zeros((b_pad, 1), f32).at[:B].set(x.astype(f32))

    def const(shape):   # VMEM-resident block (fetched once, constant index_map)
        return pl.BlockSpec(shape, lambda t: (0,) * len(shape))

    grid_spec = pltpu.PrefetchScalarGridSpec(
        num_scalar_prefetch=0,
        grid=(num_tiles,),
        in_specs=[
            pl.BlockSpec((tile_b, 1), lambda t: (t, 0)),       # x: streamed tiles
            const((1, hidden)), const((1, hidden)),            # w1 row, b1
            const((hidden, mid2)), const((1, mid2)),           # fused hidden layer
            const((mid2, out_pad)), const((1, out_pad)),       # fused output layer
        ],
        out_specs=[
            pl.BlockSpec((tile_b, out_pad), lambda t: (t, 0)),  # streamed Q tiles
            pl.BlockSpec((8, out_pad), lambda t: (t, 0)),       # per-tile col sums
        ],
    )

    q_slab, partials = pl.pallas_call(
        _make_kernel(tile_b, rows_in_last, val_col),
        out_shape=(jax.ShapeDtypeStruct((b_pad, out_pad), f32),
                   jax.ShapeDtypeStruct((num_tiles * 8, out_pad), f32)),
        grid_spec=grid_spec,
        compiler_params=pltpu.CompilerParams(
            # Tiles are now independent (mean finished in wrapper): shard the
            # batch axis across TensorCores on v7x.
            dimension_semantics=("parallel",),
        ),
    )(x_p, w1, b1, w_h, b_h, w_o, b_o)

    # Finish the GLOBAL advantage mean (spec: advantages.mean() over batch x
    # actions) in the wrapper, fused with the output slice.
    adv_sum = jnp.sum(partials[::8, :A])          # each tile wrote 8 identical rows
    mean = adv_sum / float(B * A)
    return q_slab[:B, :A] - mean


def init_params(key):
    """Deterministic init mirroring PyTorch defaults; weights stored (in, out)."""
    def linear(key, fan_in, fan_out):
        kw, kb = jax.random.split(key)
        bound = 1.0 / math.sqrt(fan_in)
        w = jax.random.uniform(kw, (fan_in, fan_out), jnp.float32, -bound, bound)
        b = jax.random.uniform(kb, (1, fan_out), jnp.float32, -bound, bound)
        return w, b

    k1, k2, k3, k4, k5 = jax.random.split(key, 5)
    w1, b1 = linear(k1, IN_DIM, HIDDEN)
    wv1, bv1 = linear(k2, HIDDEN, MID)
    wv2, bv2 = linear(k3, MID, 1)
    wa1, ba1 = linear(k4, HIDDEN, MID)
    wa2, ba2 = linear(k5, MID, MAX_ACTION_NUM)          # NoisyLinear1 base weight/bias
    # NoisyLinear1 extras: sigma_weight = -1/sqrt(in); sigma_bias = (0.5/sqrt(in))/sqrt(in)
    sigma_w = jnp.full((MID, MAX_ACTION_NUM), -1.0 / math.sqrt(MID), jnp.float32)
    sigma_b = jnp.full((1, MAX_ACTION_NUM),
                       (0.5 / math.sqrt(MID)) / math.sqrt(MID), jnp.float32)
    return (w1, b1, wv1, bv1, wv2, bv2, wa1, ba1, wa2, ba2, sigma_w, sigma_b)


def reference_forward(x, params, eps_in, eps_out, *, matmul_dtype=jnp.float32):
    """Pure-JAX reference mirroring the PyTorch forward (incl. NoisyLinear1).
    matmul_dtype=bf16 mirrors the kernel's MXU precision for a tight check."""
    (w1, b1, wv1, bv1, wv2, bv2, wa1, ba1, wa2, ba2, sigma_w, sigma_b) = params
    f = lambda e: jnp.sign(e) * jnp.sqrt(jnp.abs(e))
    f_in = f(eps_in)[:, None]                              # (MID, 1)
    f_out = f(eps_out)[None, :]                            # (1, A)
    wa2_eff = wa2 + sigma_w * (f_in * f_out)
    ba2_eff = ba2 + sigma_b * f_out
    md = matmul_dtype
    dot = lambda a, b: jnp.dot(a.astype(md), b.astype(md),
                               preferred_element_type=jnp.float32)
    h = jnp.maximum(x @ w1 + b1, 0.0)
    v = jnp.maximum(dot(h, wv1) + bv1, 0.0)
    values = dot(v, wv2) + bv2
    a = jnp.maximum(dot(h, wa1) + ba1, 0.0)
    adv = dot(a, wa2_eff) + ba2_eff
    return values + (adv - jnp.mean(adv))                  # global mean, per spec


if __name__ == "__main__":
    key = jax.random.PRNGKey(0)
    k_params, k_x, k_ei, k_eo = jax.random.split(key, 4)

    params = init_params(k_params)
    B = 20
    x = jax.random.normal(k_x, (B, IN_DIM), jnp.float32)
    # torch's .normal_() resamples the factorized-noise epsilons each forward;
    # here they are drawn by the caller so kernel and reference share them.
    eps_in = jax.random.normal(k_ei, (MID,), jnp.float32)
    eps_out = jax.random.normal(k_eo, (MAX_ACTION_NUM,), jnp.float32)

    fwd = jax.jit(dueling_forward, static_argnames=("block_rows",))

    q_ref_f32 = reference_forward(x, params, eps_in, eps_out)
    q_ref_bf16 = reference_forward(x, params, eps_in, eps_out,
                                   matmul_dtype=jnp.bfloat16)

    # multi-tile path (3 grid steps, padded + masked last tile) and single-tile path
    q_tiled = jax.block_until_ready(fwd(x, params, eps_in, eps_out, block_rows=8))
    q_full = jax.block_until_ready(fwd(x, params, eps_in, eps_out))

    assert q_tiled.shape == (B, MAX_ACTION_NUM)
    assert q_full.shape == (B, MAX_ACTION_NUM)
    # tight check vs a reference using the same bf16 MXU precision
    assert jnp.allclose(q_tiled, q_ref_bf16, atol=2e-3, rtol=2e-3)
    assert jnp.allclose(q_full, q_ref_bf16, atol=2e-3, rtol=2e-3)
    # loose check vs the exact f32 spec (bf16 matmul quantization)
    assert jnp.allclose(q_tiled, q_ref_f32, atol=1e-1, rtol=5e-2)
    assert jnp.allclose(q_full, q_ref_f32, atol=1e-1, rtol=5e-2)

    print("KERNEL_OK")
</pallas_src>

<mosaic_0001>
module attributes {stable_mosaic.version = 11 : i64} {
  func.func @kernel(%arg0: i32, %arg1: memref<8x1xf32, #tpu.memory_space<vmem>>, %arg2: memref<1x64xf32, #tpu.memory_space<vmem>>, %arg3: memref<1x64xf32, #tpu.memory_space<vmem>>, %arg4: memref<64x128xbf16, #tpu.memory_space<vmem>>, %arg5: memref<1x128xf32, #tpu.memory_space<vmem>>, %arg6: memref<128x128xbf16, #tpu.memory_space<vmem>>, %arg7: memref<1x128xf32, #tpu.memory_space<vmem>>, %arg8: memref<8x128xf32, #tpu.memory_space<vmem>>, %arg9: memref<8x128xf32, #tpu.memory_space<vmem>>) attributes {dimension_semantics = [#tpu.dimension_semantics<parallel>], iteration_bounds = array<i64: 3>, scalar_prefetch = 0 : i64, scratch_operands = 0 : i64, tpu.core_type = #tpu.core_type<tc>, window_params = [{transform_indices = @transform_0, window_bounds = array<i64: 8, 1>}, {pipeline_mode = #tpu.pipeline_mode<synchronous>, transform_indices = @transform_1, window_bounds = array<i64: 1, 64>}, {pipeline_mode = #tpu.pipeline_mode<synchronous>, transform_indices = @transform_2, window_bounds = array<i64: 1, 64>}, {pipeline_mode = #tpu.pipeline_mode<synchronous>, transform_indices = @transform_3, window_bounds = array<i64: 64, 128>}, {pipeline_mode = #tpu.pipeline_mode<synchronous>, transform_indices = @transform_4, window_bounds = array<i64: 1, 128>}, {pipeline_mode = #tpu.pipeline_mode<synchronous>, transform_indices = @transform_5, window_bounds = array<i64: 128, 128>}, {pipeline_mode = #tpu.pipeline_mode<synchronous>, transform_indices = @transform_6, window_bounds = array<i64: 1, 128>}, {transform_indices = @transform_7, window_bounds = array<i64: 8, 128>}, {transform_indices = @transform_8, window_bounds = array<i64: 8, 128>}]} {
    %c0 = arith.constant 0 : index
    %c0_0 = arith.constant 0 : index
    %0 = vector.load %arg1[%c0, %c0_0] : memref<8x1xf32, #tpu.memory_space<vmem>>, vector<8x1xf32>
    %c0_1 = arith.constant 0 : index
    %c0_2 = arith.constant 0 : index
    %1 = vector.load %arg2[%c0_1, %c0_2] : memref<1x64xf32, #tpu.memory_space<vmem>>, vector<1x64xf32>
    %2 = vector.broadcast %0 : vector<8x1xf32> to vector<8x64xf32>
    %3 = vector.broadcast %1 : vector<1x64xf32> to vector<8x64xf32>
    %4 = arith.mulf %2, %3 : vector<8x64xf32>
    %c0_3 = arith.constant 0 : index
    %c0_4 = arith.constant 0 : index
    %5 = vector.load %arg3[%c0_3, %c0_4] : memref<1x64xf32, #tpu.memory_space<vmem>>, vector<1x64xf32>
    %6 = vector.broadcast %5 : vector<1x64xf32> to vector<8x64xf32>
    %7 = arith.addf %4, %6 : vector<8x64xf32>
    %cst = arith.constant 0.000000e+00 : f32
    %8 = vector.broadcast %cst : f32 to vector<8x64xf32>
    %9 = arith.maximumf %7, %8 : vector<8x64xf32>
    %10 = arith.truncf %9 : vector<8x64xf32> to vector<8x64xbf16>
    %c0_5 = arith.constant 0 : index
    %c0_6 = arith.constant 0 : index
    %11 = vector.load %arg4[%c0_5, %c0_6] : memref<64x128xbf16, #tpu.memory_space<vmem>>, vector<64x128xbf16>
    %cst_7 = arith.constant dense<0.000000e+00> : vector<8x128xf32>
    %12 = tpu.matmul %10, %11, %cst_7 {dimension_numbers = #tpu.dot_dimension_numbers<[1], [0], [0], [1], [0, 0, 1, 1], [], []>} : vector<8x64xbf16>, vector<64x128xbf16>, vector<8x128xf32> -> vector<8x128xf32>
    %c0_8 = arith.constant 0 : index
    %c0_9 = arith.constant 0 : index
    %13 = vector.load %arg5[%c0_8, %c0_9] : memref<1x128xf32, #tpu.memory_space<vmem>>, vector<1x128xf32>
    %14 = vector.broadcast %13 : vector<1x128xf32> to vector<8x128xf32>
    %15 = arith.addf %12, %14 : vector<8x128xf32>
    %cst_10 = arith.constant 0.000000e+00 : f32
    %16 = vector.broadcast %cst_10 : f32 to vector<8x128xf32>
    %17 = arith.maximumf %15, %16 : vector<8x128xf32>
    %18 = arith.truncf %17 : vector<8x128xf32> to vector<8x128xbf16>
    %c0_11 = arith.constant 0 : index
    %c0_12 = arith.constant 0 : index
    %19 = vector.load %arg6[%c0_11, %c0_12] : memref<128x128xbf16, #tpu.memory_space<vmem>>, vector<128x128xbf16>
    %cst_13 = arith.constant dense<0.000000e+00> : vector<8x128xf32>
    %20 = tpu.matmul %18, %19, %cst_13 {dimension_numbers = #tpu.dot_dimension_numbers<[1], [0], [0], [1], [0, 0, 1, 1], [], []>} : vector<8x128xbf16>, vector<128x128xbf16>, vector<8x128xf32> -> vector<8x128xf32>
    %c0_14 = arith.constant 0 : index
    %c0_15 = arith.constant 0 : index
    %21 = vector.load %arg7[%c0_14, %c0_15] : memref<1x128xf32, #tpu.memory_space<vmem>>, vector<1x128xf32>
    %22 = vector.broadcast %21 : vector<1x128xf32> to vector<8x128xf32>
    %23 = arith.addf %20, %22 : vector<8x128xf32>
    %24 = vector.extract_strided_slice %23 {offsets = [0, 16], sizes = [8, 1], strides = [1, 1]} : vector<8x128xf32> to vector<8x1xf32>
    %25 = vector.broadcast %24 : vector<8x1xf32> to vector<8x128xf32>
    %26 = arith.addf %23, %25 : vector<8x128xf32>
    %c0_16 = arith.constant 0 : index
    %c0_17 = arith.constant 0 : index
    %27 = vector.load %arg8[%c0_16, %c0_17] : memref<8x128xf32, #tpu.memory_space<vmem>>, vector<8x128xf32>
    tpu.vector_store %arg8[%c0_16, %c0_17], %26 {strides = array<i32>} : memref<8x128xf32, #tpu.memory_space<vmem>>, vector<8x128xf32>,
    %c2_i32 = arith.constant 2 : i32
    %28 = arith.cmpi ne, %arg0, %c2_i32 : i32
    %29 = arith.extui %28 : i1 to i32
    %c0_i32 = arith.constant 0 : i32
    %30 = arith.cmpi ne, %29, %c0_i32 : i32
    scf.if %30 {
      %cst_20 = arith.constant dense<0.000000e+00> : vector<128xf32>
      %34 = vector.multi_reduction <add>, %23, %cst_20 [0] : vector<8x128xf32> to vector<128xf32>
      %35 = vector.shape_cast %34 : vector<128xf32> to vector<1x128xf32>
      %36 = vector.shape_cast %35 : vector<1x128xf32> to vector<1x128xf32>
      %37 = vector.broadcast %36 : vector<1x128xf32> to vector<8x128xf32>
      %c0_21 = arith.constant 0 : index
      %c0_22 = arith.constant 0 : index
      %38 = vector.load %arg9[%c0_21, %c0_22] : memref<8x128xf32, #tpu.memory_space<vmem>>, vector<8x128xf32>
      tpu.vector_store %arg9[%c0_21, %c0_22], %37 {strides = array<i32>} : memref<8x128xf32, #tpu.memory_space<vmem>>, vector<8x128xf32>,
    } else {
    }
    %c2_i32_18 = arith.constant 2 : i32
    %31 = arith.cmpi eq, %arg0, %c2_i32_18 : i32
    %32 = arith.extui %31 : i1 to i32
    %c0_i32_19 = arith.constant 0 : i32
    %33 = arith.cmpi ne, %32, %c0_i32_19 : i32
    scf.if %33 {
      %34 = tpu.iota {dimensions = array<i32: 0>} : vector<8x128xi32>
      %c4_i32 = arith.constant 4 : i32
      %35 = vector.broadcast %c4_i32 : i32 to vector<8x128xi32>
      %36 = arith.cmpi slt, %34, %35 : vector<8x128xi32>
      %cst_20 = arith.constant 0.000000e+00 : f32
      %37 = vector.broadcast %cst_20 : f32 to vector<8x128xf32>
      %38 = arith.select %36, %23, %37 : vector<8x128xi1>, vector<8x128xf32>
      %cst_21 = arith.constant dense<0.000000e+00> : vector<128xf32>
      %39 = vector.multi_reduction <add>, %38, %cst_21 [0] : vector<8x128xf32> to vector<128xf32>
      %40 = vector.shape_cast %39 : vector<128xf32> to vector<1x128xf32>
      %41 = vector.shape_cast %40 : vector<1x128xf32> to vector<1x128xf32>
      %42 = vector.broadcast %41 : vector<1x128xf32> to vector<8x128xf32>
      %c0_22 = arith.constant 0 : index
      %c0_23 = arith.constant 0 : index
      %43 = vector.load %arg9[%c0_22, %c0_23] : memref<8x128xf32, #tpu.memory_space<vmem>>, vector<8x128xf32>
      tpu.vector_store %arg9[%c0_22, %c0_23], %42 {strides = array<i32>} : memref<8x128xf32, #tpu.memory_space<vmem>>, vector<8x128xf32>,
    } else {
    }
    return
  }
  func.func @transform_0(%arg0: i32) -> (i32, i32) {
    %c0_i32 = arith.constant 0 : i32
    %c0_i32_0 = arith.constant 0 : i32
    return %arg0, %c0_i32 : i32, i32
  }
  func.func @transform_1(%arg0: i32) -> (i32, i32) {
    %c0_i32 = arith.constant 0 : i32
    %c0_i32_0 = arith.constant 0 : i32
    %c0_i32_1 = arith.constant 0 : i32
    return %c0_i32, %c0_i32_0 : i32, i32
  }
  func.func @transform_2(%arg0: i32) -> (i32, i32) {
    %c0_i32 = arith.constant 0 : i32
    %c0_i32_0 = arith.constant 0 : i32
    %c0_i32_1 = arith.constant 0 : i32
    return %c0_i32, %c0_i32_0 : i32, i32
  }
  func.func @transform_3(%arg0: i32) -> (i32, i32) {
    %c0_i32 = arith.constant 0 : i32
    %c0_i32_0 = arith.constant 0 : i32
    %c0_i32_1 = arith.constant 0 : i32
    return %c0_i32, %c0_i32_0 : i32, i32
  }
  func.func @transform_4(%arg0: i32) -> (i32, i32) {
    %c0_i32 = arith.constant 0 : i32
    %c0_i32_0 = arith.constant 0 : i32
    %c0_i32_1 = arith.constant 0 : i32
    return %c0_i32, %c0_i32_0 : i32, i32
  }
  func.func @transform_5(%arg0: i32) -> (i32, i32) {
    %c0_i32 = arith.constant 0 : i32
    %c0_i32_0 = arith.constant 0 : i32
    %c0_i32_1 = arith.constant 0 : i32
    return %c0_i32, %c0_i32_0 : i32, i32
  }
  func.func @transform_6(%arg0: i32) -> (i32, i32) {
    %c0_i32 = arith.constant 0 : i32
    %c0_i32_0 = arith.constant 0 : i32
    %c0_i32_1 = arith.constant 0 : i32
    return %c0_i32, %c0_i32_0 : i32, i32
  }
  func.func @transform_7(%arg0: i32) -> (i32, i32) {
    %c0_i32 = arith.constant 0 : i32
    %c0_i32_0 = arith.constant 0 : i32
    return %arg0, %c0_i32 : i32, i32
  }
  func.func @transform_8(%arg0: i32) -> (i32, i32) {
    %c0_i32 = arith.constant 0 : i32
    %c0_i32_0 = arith.constant 0 : i32
    return %arg0, %c0_i32 : i32, i32
  }
}

</mosaic_0001>

<bundles_post_ra>
// kernel: dueling_forward.1
= control target key start
LH: loop header
LB: loop body
LE: loop exit
PB: predicated region body
PF: predicated region fallthrough
CT: control target
= control target key end

     0   :  { %s808_s27 = smov 0   ;;  %s891_s0 = inlined_call_operand.vmem [shape: f32[24,1], index: 0, kind: input, shape index: {}]   ;;  %s892_s1 = inlined_call_operand.vmem [shape: f32[1,64], index: 1, kind: input, shape index: {}]   ;;  %s893_s2 = inlined_call_operand.vmem [shape: f32[1,64], index: 2, kind: input, shape index: {}]   ;;  %s894_s3 = inlined_call_operand.vmem [shape: bf16[64,128], index: 3, kind: input, shape index: {}]   ;;  %s895_s4 = inlined_call_operand.vmem [shape: f32[1,128], index: 4, kind: input, shape index: {}]   ;;  %s896_s5 = inlined_call_operand.vmem [shape: bf16[128,128], index: 5, kind: input, shape index: {}]   ;;  %s897_s6 = inlined_call_operand.vmem [shape: f32[1,128], index: 6, kind: input, shape index: {}]   ;;  %s898_s7 = inlined_call_operand.vmem [shape: f32[24,128], index: 7, kind: output, shape index: {0}]   ;;  %s899_s8 = inlined_call_operand.vmem [shape: f32[24,128], index: 8, kind: output, shape index: {1}]  }
   0x1 LB: > { %s814_s28 = sadd.s32 4294967295, %s757_s27   ;;  %p654_p0 = scmp.ge.s32.totalorder %s757_s27, 1  ;;  %s757_s27 = sphi %s808_s27, %s19_s27  }
   0x2   : > { %p264_p1 = scmp.lt.s32.totalorder %s757_s27, 4 }
   0x4   : > { %p265_p2 = pnand %p654_p0, %p264_p1 }
   0x5   : > { %p300_p3 = scmp.lt.s32.totalorder (!%p265_p2), %s814_s28, 2  ;;  %v739_v0 = vld [vmem:[%s894_s3] sm:$0xff] (!%p265_p2)   ;;  %v759_v1 = vmov (!%p265_p2), 0   ;;  %v760_v2 = vmov (!%p265_p2), 0.0   ;;  %v740_v3 = vld [vmem:[%s894_s3 + $0x8] sm:$0xff] (!%p265_p2)   ;;  %v741_v5 = vld [vmem:[%s894_s3 + $0x10] sm:$0xff] (!%p265_p2)  }
   0x6   : > { %268 = sbr.rel (%p265_p2) target bundleno = 737 (0x2e1), region = 48  ;;  %737 = vset.pattern.permute.xlu0 (!%p265_p2), %v759_v1  ;;  %693 = vmatprep.subr.bf16.mxu0 (!%p265_p2), %v760_v2  ;;  %v742_v6 = vld [vmem:[%s894_s3 + $0x18] sm:$0xff] (!%p265_p2)   ;;  %vm761_vm0 = vmmov (!%p265_p2), 0   ;;  %v743_v7 = vld [vmem:[%s896_s5] sm:$0xff] (!%p265_p2)   ;;  %v744_v8 = vld [vmem:[%s896_s5 + $0x8] sm:$0xff] (!%p265_p2)   ;;  %vm376_vm1 = vcmask (!%p265_p2), 523264  }
   0x7   : > { %694 = vmatpush3.bf16.msra.mxu0 (!%p265_p2), %v739_v0  ;;  %705 = vmatprep.subr.bf16.mxu1 (!%p265_p2), %v760_v2  ;;  %v745_v9 = vld [vmem:[%s896_s5 + $0x10] sm:$0xff] (!%p265_p2)   ;;  %v746_v10 = vld [vmem:[%s896_s5 + $0x18] sm:$0xff] (!%p265_p2)   ;;  %v747_v11 = vld [vmem:[%s896_s5 + $0x20] sm:$0xff] (!%p265_p2)   ;;  %v762_v30 = vmov (!%p265_p2), 16   ;;  %p675_p4 = scmp.eq.s32.totalorder (!%p265_p2), %s814_s28, 2 }
   0x8   : > { %695 = vmatprep.subr.bf16.mxu0 (!%p265_p2), %v760_v2  ;;  %701 = vmatprep.mubr.msk.bf16.mxu0 (!%p265_p2), %vm761_vm0, %v760_v2  ;;  %v748_v12 = vld [vmem:[%s896_s5 + $0x28] sm:$0xff] (!%p265_p2)   ;;  %v658_v13 = vld [vmem:[%s892_s1] ss:$0 sm:$0xff] (!%p265_p2)  ;;  %v749_v20 = vld [vmem:[%s896_s5 + $0x30] sm:$0xff] (!%p265_p2)  }
   0x9   : > { %721 = vmatprep.mubr.msk.bf16.mxu1 (!%p265_p2), %vm761_vm0, %v760_v2  ;;  %706 = vmatpush3.bf16.msra.mxu1 (!%p265_p2), %v743_v7  ;;  %v659_v14 = vld [vmem:[%s893_s2] ss:$0 sm:$0xff] (!%p265_p2)  ;;  %v750_v21 = vld [vmem:[%s896_s5 + $0x38] sm:$0xff] (!%p265_p2)  }
   0xa   : > { %707 = vmatprep.subr.bf16.mxu1 (!%p265_p2), %v760_v2  ;;  %v660_v22 = vld [vmem:[%s895_s4] ss:$0 sm:$0xff] (!%p265_p2) }
   0xb   : > { %696 = vmatpush3.bf16.msra.mxu0 (!%p265_p2), %v740_v3  ;;  %v666_v31 = vld [vmem:[%s897_s6] ss:$0 sm:$0xff] (!%p265_p2) }
   0xc   : > { %697 = vmatprep.subr.bf16.mxu0 (!%p265_p2), %v760_v2 }
   0xd   : > { %s301_s9 = scalar_select %p300_p3, %s814_s28, 2  ;;  %708 = vmatpush3.bf16.msra.mxu1 %v744_v8 }
   0xe   : > { %709 = vmatprep.subr.bf16.mxu1 %v760_v2 }
   0xf   : > { %s826_s12 = sshll.u32 %s301_s9, 3  ;;  %698 = vmatpush3.bf16.msra.mxu0 %v741_v5 }
  0x10   : > { %s303_s15 = scalar_lea.vmem %s891_s0, %s826_s12  ;;  %s836_s18 = scalar_lea.vmem %s899_s8, %s826_s12  ;;  %699 = vmatprep.subr.bf16.mxu0 %v760_v2 }
  0x11   : > { %v313_v4 = vld [vmem:[%s303_s15] sm:$0xff]  ;;  %710 = vmatpush3.bf16.msra.mxu1 %v745_v9  ;;  %s307_s11 = scalar_lea.vmem %s898_s7, %s826_s12 }
  0x12   : > { %317 = vperm.xlu0 %737, %v313_v4   ;;  %711 = vmatprep.subr.bf16.mxu1 %v760_v2 }
  0x13   : > { %700 = vmatpush3.bf16.msra.mxu0 %v742_v6 }
  0x15   : > { %712 = vmatpush3.bf16.msra.mxu1 %v746_v10 }
  0x16   : > { %713 = vmatprep.subr.bf16.mxu1 %v760_v2  ;;  %738 = vset.pattern.permute.xlu0 %v762_v30 }
  0x19   : > { %714 = vmatpush3.bf16.msra.mxu1 %v747_v11 }
  0x1a   : > { %715 = vmatprep.subr.bf16.mxu1 %v760_v2 }
  0x1d   : > { %716 = vmatpush3.bf16.msra.mxu1 %v748_v12 }
  0x1e   : > { %717 = vmatprep.subr.bf16.mxu1 %v760_v2 }
  0x21   : > { %718 = vmatpush3.bf16.msra.mxu1 %v749_v20 }
  0x22   : > { %719 = vmatprep.subr.bf16.mxu1 %v760_v2 }
  0x25   : > { %720 = vmatpush3.bf16.msra.mxu1 %v750_v21 }
  0x91   : > { %v318_v15 = vpop.permute.xlu0 %317 }
  0x92   : > { %v326_v16 = vmul.f32 %v658_v13, %v318_v15 }
  0x94   : > { %v334_v17 = vadd.f32 %v659_v14, %v326_v16 }
  0x96   : > { %v335_v18 = vmax.f32 %v334_v17, 0.0 }
  0x98   : > { %v336_v19 = vpack.c.bf16 %v335_v18, %v335_v18 }
  0x9a   : > { %702 = vmatmul.mubr.msk.bf16.vlgmr.msra.gmra.mrb[0].mxu0 %vm376_vm1, %v336_v19 }
 0x16d   : > { %v414_v23 = vpop.f32.mrb[0].mxu0 }
 0x16e   : > { %v415_v24 = vadd.f32 %v660_v22, %v414_v23  ;;  %v703_v25 = vpop.f32.mrb[1].mxu0 }
 0x16f   : > { %v417_v26 = vpop.f32.mrb[2].mxu0 }
 0x170   : > { %v420_v27 = vmax.f32 %v415_v24, 0.0  ;;  %v704_v28 = vpop.f32.mrb[3].mxu0 }
 0x172   : > { %v421_v29 = vpack.c.bf16 %v420_v27, %v420_v27 }
 0x174   : > { %722 = vmatmul.mubr.bf16.vlgmr.msra.gmra.mrb[0].mxu1 %v421_v29 }
 0x247   : > { %v527_v32 = vpop.f32.mrb[0].mxu1 }
 0x248   : > { %v528_v33 = vadd.f32 %v666_v31, %v527_v32  ;;  %v723_v34 = vpop.f32.mrb[1].mxu1 }
 0x249   : > { %v530_v35 = vpop.f32.mrb[2].mxu1 }
 0x24a   : > { %535 = vperm.xlu0 %738, %v528_v33   ;;  %v724_v36 = vpop.f32.mrb[3].mxu1  ;;  %v544_v39 = vrot.slane (!%p675_p4), %v528_v33, 4 }
 0x24c   : > { %v545_v40 = vadd.f32 (!%p675_p4), %v544_v39, %v528_v33 }
 0x24e   : > { %v546_v41 = vrot.slane (!%p675_p4), %v545_v40, 2 }
 0x250   : > { %v547_v42 = vadd.f32 (!%p675_p4), %v546_v41, %v545_v40 }
 0x252   : > { %v548_v43 = vrot.slane (!%p675_p4), %v547_v42, 1 }
 0x254   : > { %v549_v44 = vadd.f32 (!%p675_p4), %v548_v43, %v547_v42 }
 0x256   : > { %550 = vst [vmem:[%s836_s18] sm:$0xff] (!%p675_p4), %v549_v44 }
 0x2c6   : > { %543 = sbr.rel (%p675_p4) target bundleno = 717 (0x2cd), region = 52 }
 0x2c9   : > { %v536_v37 = vpop.permute.xlu0 %535 }
 0x2ca   : > { %v538_v38 = vadd.f32 %v536_v37, %v528_v33 }
 0x2cc   : > { %539 = vst [vmem:[%s307_s11] sm:$0xff] %v538_v38 }
 0x2cd PF: > { %p676_p5 = scmp.ne.s32.totalorder %s814_s28, 2 }
 0x2ce   : > { %v555_v45 = vlaneseq (!%p676_p5) }
 0x2cf   : > { %554 = sbr.rel (%p676_p5) target bundleno = 737 (0x2e1), region = 56 }
 0x2d0   : > { %v556_v46 = vshrl.u32 (!%p676_p5), %v555_v45, 7 }
 0x2d2   : > { %vm557_vm2 = vcmp.lt.s32.totalorder (!%p676_p5), %v556_v46, 4 }
 0x2d3   : > { %v558_v47 = vsel (!%p676_p5), %vm557_vm2, %v528_v33, 0.0 }
 0x2d4   : > { %v559_v48 = vrot.slane (!%p676_p5), %v558_v47, 4 }
 0x2d6   : > { %v560_v49 = vadd.f32 %v559_v48, %v558_v47 }
 0x2d8   : > { %v561_v50 = vrot.slane %v560_v49, 2 }
 0x2da   : > { %v562_v51 = vadd.f32 %v561_v50, %v560_v49 }
 0x2dc   : > { %v563_v52 = vrot.slane %v562_v51, 1 }
 0x2de   : > { %v564_v53 = vadd.f32 %v563_v52, %v562_v51 }
 0x2e0   : > { %565 = vst [vmem:[%s836_s18] sm:$0xff] %v564_v53 }
 0x2e1 PF: > { %s19_s27 = sadd.s32 1, %s757_s27  }
 0x2e2   : > { %p16_p6 = scmp.ge.s32.totalorder %s19_s27, 5  }
 0x2e4   :  { %18 = sbr.rel (!%p16_p6) target bundleno = 1 (0x1), region = 98 }

</bundles_post_ra>
